<compile_context>
chip_gen: v5e
topology: v5e:2x2
jax: 0.10.0
libtpu: 0.0.40
codegen_flags: <defaults>
</compile_context>

<pallas_src>
import functools

import jax
import jax.numpy as jnp
from jax.experimental import pallas as pl
from jax.experimental.pallas import tpu as pltpu

REF_ENC_FILTERS = [32, 32, 64, 64, 128, 128]
GRU_HIDDEN = 128            # 256 // 2
LANE = 128                  # vreg lane width
SUBLANE = 8                 # vreg sublane width
TILE_M = 1024               # max row tile for the conv / projection matmuls
GRU_T_CHUNK = 64            # timesteps folded per grid step in the GRU kernel
GRU_UNROLL = 8              # partial unroll of the in-kernel GRU time loop
VMEM_LIMIT = 48 * 1024 * 1024   # <= v7x 64 MiB ceiling; actual use is a few MiB


def _round_up(x, m):
    return (x + m - 1) // m * m


def _pick_row_tile(R, tile_max):
    """Row tile + padded row count. Small problems split into ~2 tiles so a
    'parallel' grid axis keeps both v7x TensorCores busy."""
    r8 = _round_up(max(R, 1), SUBLANE)
    if r8 <= tile_max:
        tm = max(SUBLANE, _round_up(-(-R // 2), SUBLANE))
    else:
        tm = tile_max
    return tm, _round_up(R, tm)


def calculate_channels(L, kernel_size, stride, pad, n_convs):
    for _ in range(n_convs):
        L = (L - kernel_size + 2 * pad) // stride + 1
    return L


# ---------------------------------------------------------------------------
# Generic row-tiled matmul + bias (+ optional ReLU) kernel
# ---------------------------------------------------------------------------

def _matmul_bias_kernel(x_ref, w_ref, b_ref, o_ref, *, relu):
    acc = jnp.dot(x_ref[...], w_ref[...], preferred_element_type=jnp.float32)
    acc = acc + b_ref[...]
    if relu:
        acc = jnp.maximum(acc, 0.0)
    o_ref[...] = acc.astype(o_ref.dtype)


def tiled_matmul_bias(x, w, b, *, relu, out_dtype=jnp.bfloat16, tile_m=TILE_M):
    """y = act(x @ w + b), row-tiled over x's rows.

    x: [R, K], w: [K, Nc], b: [Nc]. K is zero-padded only to the sublane width
    (8); Nc must be a multiple of 128 (lane-dense output). Matmul operands are
    bf16; accumulation and the bias/activation epilogue are f32.
    """
    R, K = x.shape
    Kw, Nc = w.shape
    assert K == Kw and Nc % LANE == 0

    k_pad = _round_up(K, SUBLANE)
    tm, r_pad = _pick_row_tile(R, tile_m)

    xp = x
    if (r_pad, k_pad) != (R, K):
        xp = jnp.pad(x, ((0, r_pad - R), (0, k_pad - K)))
    wp = w if k_pad == K else jnp.pad(w, ((0, k_pad - K), (0, 0)))

    xp = xp.astype(jnp.bfloat16)
    wp = wp.astype(jnp.bfloat16)
    bp = b.reshape(1, Nc).astype(jnp.float32)

    out = pl.pallas_call(
        functools.partial(_matmul_bias_kernel, relu=relu),
        out_shape=jax.ShapeDtypeStruct((r_pad, Nc), out_dtype),
        grid_spec=pltpu.PrefetchScalarGridSpec(
            num_scalar_prefetch=0,
            grid=(r_pad // tm,),
            in_specs=[
                pl.BlockSpec((tm, k_pad), lambda i: (i, 0)),
                pl.BlockSpec((k_pad, Nc), lambda i: (0, 0)),
                pl.BlockSpec((1, Nc), lambda i: (0, 0)),
            ],
            out_specs=pl.BlockSpec((tm, Nc), lambda i: (i, 0)),
        ),
        compiler_params=pltpu.CompilerParams(
            dimension_semantics=("parallel",),
            vmem_limit_bytes=VMEM_LIMIT,
            # let XLA fuse the pad/strided-slice/concat/cast that produce the
            # patches into the pallas input DMA when the fusion applies.
            allow_input_fusion=[True, False, False],
        ),
    )(xp, wp, bp)
    return out[:R] if r_pad != R else out


# ---------------------------------------------------------------------------
# LayerNorm (row tiled, bf16 output)
# ---------------------------------------------------------------------------

def _layernorm_kernel(x_ref, g_ref, b_ref, o_ref):
    x = x_ref[...].astype(jnp.float32)
    mean = jnp.mean(x, axis=-1, keepdims=True)
    var = jnp.mean(jnp.square(x - mean), axis=-1, keepdims=True)
    xn = (x - mean) * jax.lax.rsqrt(var + 1e-5)
    o_ref[...] = (xn * g_ref[...] + b_ref[...]).astype(o_ref.dtype)


def layernorm(x2d, gamma, beta, *, out_dtype=jnp.bfloat16, tile_r=TILE_M):
    # x2d: [R, spec_channels]  (rows = N * Ty)
    R, M = x2d.shape
    tr, r_pad = _pick_row_tile(R, tile_r)
    xp = x2d if r_pad == R else jnp.pad(x2d, ((0, r_pad - R), (0, 0)))
    out = pl.pallas_call(
        _layernorm_kernel,
        out_shape=jax.ShapeDtypeStruct((r_pad, M), out_dtype),
        grid_spec=pltpu.PrefetchScalarGridSpec(
            num_scalar_prefetch=0,
            grid=(r_pad // tr,),
            in_specs=[
                pl.BlockSpec((tr, M), lambda i: (i, 0)),
                pl.BlockSpec((1, M), lambda i: (0, 0)),
                pl.BlockSpec((1, M), lambda i: (0, 0)),
            ],
            out_specs=pl.BlockSpec((tr, M), lambda i: (i, 0)),
        ),
        compiler_params=pltpu.CompilerParams(
            dimension_semantics=("parallel",),
            vmem_limit_bytes=VMEM_LIMIT,
        ),
    )(xp, gamma.reshape(1, M), beta.reshape(1, M))
    return out[:R] if r_pad != R else out


# ---------------------------------------------------------------------------
# Conv2d(3x3, stride=2, pad=1) + ReLU as a row-tiled patches x weight matmul
# ---------------------------------------------------------------------------

def conv2d_s2_relu(x_nhwc, w_oihw, bias):
    """Returns (y_padded, Cout) with y_padded: [N, Ho, Wo, round_up(Cout,128)],
    bf16.  Channel dim zero-padded to 128 lanes (lane-dense stores); callers
    slice back to the real channel count lazily."""
    N, H, W, Cin = x_nhwc.shape
    Cout = w_oihw.shape[0]
    Ho = (H - 1) // 2 + 1
    Wo = (W - 1) // 2 + 1

    # im2col in JAX glue, built directly in bf16 (source tensors are bf16).
    # TODO(synk): build the 9 taps inside the kernel from a phase-decomposed
    # padded input to fully eliminate the expanded-patches HBM traffic.
    xp = jnp.pad(x_nhwc, ((0, 0), (1, 1), (1, 1), (0, 0)))
    cols = []
    for kh in range(3):
        for kw in range(3):
            cols.append(xp[:, kh:kh + 2 * Ho - 1:2, kw:kw + 2 * Wo - 1:2, :])
    patches = jnp.concatenate(cols, axis=-1).reshape(N * Ho * Wo, 9 * Cin)

    # flatten PyTorch weight [Cout, Cin, 3, 3] consistent with (kh, kw, cin),
    # zero-pad the output channels to a full 128-lane width.
    cout_pad = _round_up(Cout, LANE)
    wf = jnp.transpose(w_oihw, (2, 3, 1, 0)).reshape(9 * Cin, Cout)
    wf = jnp.pad(wf, ((0, 0), (0, cout_pad - Cout)))
    bp = jnp.pad(bias, (0, cout_pad - Cout))

    out = tiled_matmul_bias(patches, wf, bp, relu=True, out_dtype=jnp.bfloat16)
    return out.reshape(N, Ho, Wo, cout_pad), Cout


# ---------------------------------------------------------------------------
# GRU recurrence (input projection hoisted out) + final Linear projection
# ---------------------------------------------------------------------------

def _gru_recurrent_kernel(gi_ref, whh_ref, bhh_ref, wp_ref, bp_ref, o_ref,
                          h_scr, *, t_real, t_chunk, unroll):
    c = pl.program_id(0)

    @pl.when(c == 0)
    def _():
        h_scr[...] = jnp.zeros_like(h_scr)

    def step(i, h):
        gi = gi_ref[i].astype(jnp.float32)                       # [Np, 3H]
        gh = jnp.dot(h.astype(jnp.bfloat16), whh_ref[...],
                     preferred_element_type=jnp.float32) + bhh_ref[...]
        hd = h.shape[-1]
        r = jax.nn.sigmoid(gi[:, :hd] + gh[:, :hd])
        z = jax.nn.sigmoid(gi[:, hd:2 * hd] + gh[:, hd:2 * hd])
        n = jnp.tanh(gi[:, 2 * hd:] + r * gh[:, 2 * hd:])
        h_new = (1.0 - z) * n + z * h
        valid = (c * t_chunk + i) < t_real                       # mask time padding
        return jnp.where(valid, h_new, h)

    h = jax.lax.fori_loop(0, t_chunk, step, h_scr[...], unroll=unroll)
    h_scr[...] = h

    @pl.when(c == pl.num_programs(0) - 1)
    def _():
        y = jnp.dot(h.astype(jnp.bfloat16), wp_ref[...],
                    preferred_element_type=jnp.float32) + bp_ref[...]
        o_ref[...] = y.astype(o_ref.dtype)


def gru_then_proj(x_tnd, w_ih, w_hh, b_ih, b_hh, w_proj, b_proj):
    T, N, D = x_tnd.shape
    H = GRU_HIDDEN
    G = w_proj.shape[0]
    n_pad = _round_up(max(N, SUBLANE), SUBLANE)
    g_pad = _round_up(G, LANE)

    # Pad batch to the sublane width (padded rows are sliced away at the end).
    x_p = jnp.pad(x_tnd, ((0, 0), (0, n_pad - N), (0, 0)))

    # Input projection for all timesteps in one batched, tiled matmul.
    # Gate pre-activations kept in bf16 (gate math itself stays f32 in-kernel).
    gi = tiled_matmul_bias(x_p.reshape(T * n_pad, D), w_ih.T, b_ih,
                           relu=False, out_dtype=jnp.bfloat16)
    gi = gi.reshape(T, n_pad, 3 * H)

    # Chunk the sequential time loop inside the kernel.
    t_chunk = T if T <= GRU_T_CHUNK else GRU_T_CHUNK
    t_pad = _round_up(T, t_chunk)
    if t_pad != T:
        gi = jnp.pad(gi, ((0, t_pad - T), (0, 0), (0, 0)))

    whh = w_hh.T.astype(jnp.bfloat16)                       # [H, 3H]
    bhh = b_hh.reshape(1, 3 * H).astype(jnp.float32)
    wp = jnp.pad(w_proj.T, ((0, 0), (0, g_pad - G))).astype(jnp.bfloat16)
    bp = jnp.pad(b_proj, (0, g_pad - G)).reshape(1, g_pad).astype(jnp.float32)

    unroll = max(1, min(GRU_UNROLL, t_chunk))
    out = pl.pallas_call(
        functools.partial(_gru_recurrent_kernel, t_real=T, t_chunk=t_chunk,
                          unroll=unroll),
        out_shape=jax.ShapeDtypeStruct((n_pad, g_pad), jnp.float32),
        grid_spec=pltpu.PrefetchScalarGridSpec(
            num_scalar_prefetch=0,
            grid=(t_pad // t_chunk,),
            in_specs=[
                pl.BlockSpec((t_chunk, n_pad, 3 * H), lambda c: (c, 0, 0)),
                pl.BlockSpec((H, 3 * H), lambda c: (0, 0)),
                pl.BlockSpec((1, 3 * H), lambda c: (0, 0)),
                pl.BlockSpec((H, g_pad), lambda c: (0, 0)),
                pl.BlockSpec((1, g_pad), lambda c: (0, 0)),
            ],
            out_specs=pl.BlockSpec((n_pad, g_pad), lambda c: (0, 0)),
            scratch_shapes=[pltpu.VMEM((n_pad, H), jnp.float32)],
        ),
        compiler_params=pltpu.CompilerParams(
            dimension_semantics=("arbitrary",),
            vmem_limit_bytes=VMEM_LIMIT,
        ),
    )(gi, whh, bhh, wp, bp)
    return out[:N, :G]


# ---------------------------------------------------------------------------
# ReferenceEncoder forward (glue + kernels)
# ---------------------------------------------------------------------------

def reference_encoder_forward(inputs, params):
    # inputs: [N, Ty, spec_channels]  (matches PyTorch's [N, Ty/r, n_mels*r])
    N, Ty, M = inputs.shape
    x = layernorm(inputs.reshape(N * Ty, M), params["ln_gamma"], params["ln_beta"])
    out = x.reshape(N, Ty, M, 1)  # NHWC; PyTorch view is [N, 1, Ty, M] (NCHW)
    for w, b in zip(params["conv_w"], params["conv_b"]):
        out_padded, cout = conv2d_s2_relu(out, w, b)
        out = out_padded[..., :cout]  # drop lane padding (lazy slice, fused downstream)
    # out: [N, T', M', C=128] (NHWC). PyTorch: NCHW -> transpose(1,2) -> view
    # [N, T', C*M'] with channel-major flatten order.
    Np, Tp, Mp, C = out.shape
    out = jnp.transpose(out, (0, 1, 3, 2)).reshape(Np, Tp, C * Mp)
    x_tnd = jnp.transpose(out, (1, 0, 2))  # [T', N, D]
    return gru_then_proj(
        x_tnd,
        params["gru_w_ih"], params["gru_w_hh"],
        params["gru_b_ih"], params["gru_b_hh"],
        params["proj_w"], params["proj_b"],
    )  # [N, gin_channels]


def init_params(key, spec_channels, gin_channels):
    filters = [1] + REF_ENC_FILTERS
    K = len(REF_ENC_FILTERS)
    keys = jax.random.split(key, 2 * K + 8)
    idx = 0
    conv_w, conv_b = [], []
    for i in range(K):
        cin, cout = filters[i], filters[i + 1]
        fan_in = float(cin * 9)
        w = jax.random.normal(keys[idx], (cout, cin, 3, 3), jnp.float32) / jnp.sqrt(fan_in)
        idx += 1
        b = 0.01 * jax.random.normal(keys[idx], (cout,), jnp.float32)
        idx += 1
        conv_w.append(w)
        conv_b.append(b)
    out_channels = calculate_channels(spec_channels, 3, 2, 1, K)
    d_in = REF_ENC_FILTERS[-1] * out_channels
    H = GRU_HIDDEN
    w_ih = jax.random.normal(keys[idx], (3 * H, d_in), jnp.float32) / jnp.sqrt(float(d_in)); idx += 1
    w_hh = jax.random.normal(keys[idx], (3 * H, H), jnp.float32) / jnp.sqrt(float(H)); idx += 1
    b_ih = 0.01 * jax.random.normal(keys[idx], (3 * H,), jnp.float32); idx += 1
    b_hh = 0.01 * jax.random.normal(keys[idx], (3 * H,), jnp.float32); idx += 1
    w_proj = jax.random.normal(keys[idx], (gin_channels, H), jnp.float32) / jnp.sqrt(float(H)); idx += 1
    b_proj = 0.01 * jax.random.normal(keys[idx], (gin_channels,), jnp.float32); idx += 1
    return dict(
        ln_gamma=jnp.ones((spec_channels,), jnp.float32),
        ln_beta=jnp.zeros((spec_channels,), jnp.float32),
        conv_w=conv_w, conv_b=conv_b,
        gru_w_ih=w_ih, gru_w_hh=w_hh, gru_b_ih=b_ih, gru_b_hh=b_hh,
        proj_w=w_proj, proj_b=b_proj,
    )


if __name__ == "__main__":
    spec_channels = 32     # n_mels * r
    gin_channels = 256
    N, Ty = 2, 128         # 128 time frames -> T' = 2 after 6 stride-2 convs

    key = jax.random.PRNGKey(0)
    k_in, k_par = jax.random.split(key)
    inputs = jax.random.normal(k_in, (N, Ty, spec_channels), jnp.float32)
    params = init_params(k_par, spec_channels, gin_channels)

    out = reference_encoder_forward(inputs, params)
    out = jax.block_until_ready(out)
    assert out.shape == (N, gin_channels), out.shape
    assert jnp.all(jnp.isfinite(out))
    print("KERNEL_OK")
</pallas_src>

<mosaic_0001>
module attributes {stable_mosaic.version = 11 : i64} {
  func.func @_layernorm_kernel(%arg0: i32, %arg1: memref<128x32xf32, #tpu.memory_space<vmem>>, %arg2: memref<1x32xf32, #tpu.memory_space<vmem>>, %arg3: memref<1x32xf32, #tpu.memory_space<vmem>>, %arg4: memref<128x32xbf16, #tpu.memory_space<vmem>>) attributes {dimension_semantics = [#tpu.dimension_semantics<parallel>], iteration_bounds = array<i64: 2>, scalar_prefetch = 0 : i64, scratch_operands = 0 : i64, tpu.core_type = #tpu.core_type<tc>, window_params = [{transform_indices = @transform_0, window_bounds = array<i64: 128, 32>}, {pipeline_mode = #tpu.pipeline_mode<synchronous>, transform_indices = @transform_1, window_bounds = array<i64: 1, 32>}, {pipeline_mode = #tpu.pipeline_mode<synchronous>, transform_indices = @transform_2, window_bounds = array<i64: 1, 32>}, {transform_indices = @transform_3, window_bounds = array<i64: 128, 32>}]} {
    %c0 = arith.constant 0 : index
    %c0_0 = arith.constant 0 : index
    %0 = vector.load %arg1[%c0, %c0_0] : memref<128x32xf32, #tpu.memory_space<vmem>>, vector<128x32xf32>
    %cst = arith.constant dense<0.000000e+00> : vector<128xf32>
    %1 = vector.multi_reduction <add>, %0, %cst [1] : vector<128x32xf32> to vector<128xf32>
    %2 = vector.shape_cast %1 : vector<128xf32> to vector<128x1xf32>
    %cst_1 = arith.constant 3.200000e+01 : f32
    %3 = vector.broadcast %cst_1 : f32 to vector<128x1xf32>
    %4 = arith.divf %2, %3 : vector<128x1xf32>
    %5 = vector.broadcast %4 : vector<128x1xf32> to vector<128x32xf32>
    %6 = arith.subf %0, %5 : vector<128x32xf32>
    %7 = arith.mulf %6, %6 : vector<128x32xf32>
    %cst_2 = arith.constant dense<0.000000e+00> : vector<128xf32>
    %8 = vector.multi_reduction <add>, %7, %cst_2 [1] : vector<128x32xf32> to vector<128xf32>
    %9 = vector.shape_cast %8 : vector<128xf32> to vector<128x1xf32>
    %cst_3 = arith.constant 3.200000e+01 : f32
    %10 = vector.broadcast %cst_3 : f32 to vector<128x1xf32>
    %11 = arith.divf %9, %10 : vector<128x1xf32>
    %12 = vector.broadcast %4 : vector<128x1xf32> to vector<128x32xf32>
    %13 = arith.subf %0, %12 : vector<128x32xf32>
    %cst_4 = arith.constant 9.99999974E-6 : f32
    %14 = vector.broadcast %cst_4 : f32 to vector<128x1xf32>
    %15 = arith.addf %11, %14 : vector<128x1xf32>
    %16 = math.rsqrt %15 : vector<128x1xf32>
    %17 = vector.broadcast %16 : vector<128x1xf32> to vector<128x32xf32>
    %18 = arith.mulf %13, %17 : vector<128x32xf32>
    %c0_5 = arith.constant 0 : index
    %c0_6 = arith.constant 0 : index
    %19 = vector.load %arg2[%c0_5, %c0_6] : memref<1x32xf32, #tpu.memory_space<vmem>>, vector<1x32xf32>
    %20 = vector.broadcast %19 : vector<1x32xf32> to vector<128x32xf32>
    %21 = arith.mulf %18, %20 : vector<128x32xf32>
    %c0_7 = arith.constant 0 : index
    %c0_8 = arith.constant 0 : index
    %22 = vector.load %arg3[%c0_7, %c0_8] : memref<1x32xf32, #tpu.memory_space<vmem>>, vector<1x32xf32>
    %23 = vector.broadcast %22 : vector<1x32xf32> to vector<128x32xf32>
    %24 = arith.addf %21, %23 : vector<128x32xf32>
    %25 = arith.truncf %24 : vector<128x32xf32> to vector<128x32xbf16>
    %c0_9 = arith.constant 0 : index
    %c0_10 = arith.constant 0 : index
    %26 = vector.load %arg4[%c0_9, %c0_10] : memref<128x32xbf16, #tpu.memory_space<vmem>>, vector<128x32xbf16>
    tpu.vector_store %arg4[%c0_9, %c0_10], %25 {strides = array<i32>} : memref<128x32xbf16, #tpu.memory_space<vmem>>, vector<128x32xbf16>,
    return
  }
  func.func @transform_0(%arg0: i32) -> (i32, i32) {
    %c0_i32 = arith.constant 0 : i32
    %c0_i32_0 = arith.constant 0 : i32
    return %arg0, %c0_i32 : i32, i32
  }
  func.func @transform_1(%arg0: i32) -> (i32, i32) {
    %c0_i32 = arith.constant 0 : i32
    %c0_i32_0 = arith.constant 0 : i32
    %c0_i32_1 = arith.constant 0 : i32
    return %c0_i32, %c0_i32_0 : i32, i32
  }
  func.func @transform_2(%arg0: i32) -> (i32, i32) {
    %c0_i32 = arith.constant 0 : i32
    %c0_i32_0 = arith.constant 0 : i32
    %c0_i32_1 = arith.constant 0 : i32
    return %c0_i32, %c0_i32_0 : i32, i32
  }
  func.func @transform_3(%arg0: i32) -> (i32, i32) {
    %c0_i32 = arith.constant 0 : i32
    %c0_i32_0 = arith.constant 0 : i32
    return %arg0, %c0_i32 : i32, i32
  }
}

</mosaic_0001>

<bundles_post_ra>
// kernel: tpu_custom_call.1
= control target key start
LH: loop header
LB: loop body
LE: loop exit
PB: predicated region body
PF: predicated region fallthrough
CT: control target
= control target key end

     0   :  { %s764_s12 = smov 0   ;;  %s1233_s0 = inlined_call_operand.vmem [shape: f32[256,32], index: 0, kind: input, shape index: {}]   ;;  %s1234_s1 = inlined_call_operand.vmem [shape: f32[1,32], index: 1, kind: input, shape index: {}]   ;;  %s1235_s2 = inlined_call_operand.vmem [shape: f32[1,32], index: 2, kind: input, shape index: {}]   ;;  %s1236_s3 = inlined_call_operand.vmem [shape: bf16[256,32], index: 3, kind: output, shape index: {}]  }
   0x1 LB: > { %s679_s13 = sadd.s32 4294967295, %s741_s12   ;;  %p683_p0 = scmp.ge.s32.totalorder %s741_s12, 1  ;;  %s741_s12 = sphi %s764_s12, %s13_s12  }
   0x2   : > { %p138_p1 = scmp.lt.s32.totalorder %s741_s12, 3 }
   0x4   : > { %p139_p2 = pnand %p683_p0, %p138_p1 }
   0x5   : > { %s684_s14 = sshll.u32 (!%p139_p2), %s679_s13, 4 }
   0x6   : > { %142 = sbr.rel (%p139_p2) target bundleno = 336 (0x150), region = 32  ;;  %p163_p3 = scmp.lt.s32.totalorder (!%p139_p2), %s684_s14, 31 }
   0xb   : > { %s1240_s14 = smov (!%p163_p3, %s684_s14), 31  ;;  %vm190_vm0 = vcmask 261120   ;;  %v743_v32 = vmov 32.0   ;;  %vm606_vm5 = vcmask 257024  }
   0xc   : > { %s685_s15 = sshll.u32 %s1240_s14, 3  ;;  %701 = vrcp.f32 %v743_v32  ;;  %s687_s23 = sshll.u32 %s1240_s14, 2 }
   0xd   : > { %s778_s18 = scalar_lea.vmem %s1233_s0, %s685_s15  ;;  %s1033_s26 = scalar_lea.vmem %s1236_s3, %s687_s23 }
   0xe   : > { %v781_v0 = vld [vmem:[%s778_s18 + $0x20] sm:$0xff]  ;;  %v176_v1 = vld [vmem:[%s778_s18 + $0x10] sm:$0xff]  ;;  %v790_v6 = vld [vmem:[%s778_s18 + $0x28] sm:$0xff] }
   0xf   : > { %v174_v2 = vld [vmem:[%s778_s18] sm:$0xff]  ;;  %v203_v3 = vsel %vm190_vm0, %v781_v0, 0.0  ;;  %v197_v4 = vsel %vm190_vm0, %v176_v1, 0.0  ;;  %v793_v7 = vld [vmem:[%s778_s18 + $0x18] sm:$0xff]  ;;  %v796_v8 = vld [vmem:[%s778_s18 + $0x8] sm:$0xff]  ;;  %v206_v9 = vsel %vm190_vm0, %v790_v6, 0.0 }
  0x10   : > { %v191_v5 = vsel %vm190_vm0, %v174_v2, 0.0  ;;  %204 = vadd.xlane.f32.xlu2 %v203_v3  ;;  %198 = vadd.xlane.f32.xlu1 %v197_v4  ;;  %v200_v10 = vsel %vm190_vm0, %v793_v7, 0.0  ;;  %v194_v11 = vsel %vm190_vm0, %v796_v8, 0.0  ;;  %v805_v12 = vld [vmem:[%s778_s18 + $0x40] sm:$0xff]  ;;  %v808_v13 = vld [vmem:[%s778_s18 + $0x38] sm:$0xff]  ;;  %v811_v14 = vld [vmem:[%s778_s18 + $0x30] sm:$0xff] }
  0x11   : > { %192 = vadd.xlane.f32.xlu0 %v191_v5  ;;  %v215_v15 = vsel %vm190_vm0, %v805_v12, 0.0  ;;  %v212_v16 = vsel %vm190_vm0, %v808_v13, 0.0  ;;  %v209_v17 = vsel %vm190_vm0, %v811_v14, 0.0  ;;  %v820_v18 = vld [vmem:[%s778_s18 + $0x58] sm:$0xff]  ;;  %v823_v19 = vld [vmem:[%s778_s18 + $0x50] sm:$0xff]  ;;  %v826_v20 = vld [vmem:[%s778_s18 + $0x48] sm:$0xff] }
  0x12   : > { %v224_v21 = vsel %vm190_vm0, %v820_v18, 0.0  ;;  %v221_v22 = vsel %vm190_vm0, %v823_v19, 0.0  ;;  %v218_v23 = vsel %vm190_vm0, %v826_v20, 0.0  ;;  %v835_v24 = vld [vmem:[%s778_s18 + $0x70] sm:$0xff]  ;;  %v838_v25 = vld [vmem:[%s778_s18 + $0x68] sm:$0xff]  ;;  %v841_v26 = vld [vmem:[%s778_s18 + $0x60] sm:$0xff]  ;;  %v702_v33 = vpop.eup %701 }
  0x13   : > { %v233_v27 = vsel %vm190_vm0, %v835_v24, 0.0  ;;  %v230_v28 = vsel %vm190_vm0, %v838_v25, 0.0  ;;  %v227_v29 = vsel %vm190_vm0, %v841_v26, 0.0  ;;  %v850_v30 = vld [vmem:[%s778_s18 + $0x78] sm:$0xff]  ;;  %v240_v34 = vmul.f32 32.0, %v702_v33 }
  0x14   : > { %v236_v31 = vsel %vm190_vm0, %v850_v30, 0.0  ;;  %vm244_vm1 = vweird.f32 %v702_v33 }
  0x15   : > { %v241_v35 = vsub.f32 1.0, %v240_v34 }
  0x17   : > { %v242_v36 = vmul.f32 %v702_v33, %v241_v35 }
  0x18   : > { %207 = vadd.xlane.f32.xlu2 %v206_v9  ;;  %201 = vadd.xlane.f32.xlu1 %v200_v10 }
  0x19   : > { %195 = vadd.xlane.f32.xlu0 %v194_v11  ;;  %v243_v37 = vadd.f32 %v702_v33, %v242_v36 }
  0x1b   : > { %v854_v38 = vsel %vm244_vm1, %v702_v33, %v243_v37 }
  0x20   : > { %216 = vadd.xlane.f32.xlu2 %v215_v15  ;;  %213 = vadd.xlane.f32.xlu1 %v212_v16 }
  0x21   : > { %210 = vadd.xlane.f32.xlu0 %v209_v17 }
  0x28   : > { %225 = vadd.xlane.f32.xlu2 %v224_v21  ;;  %222 = vadd.xlane.f32.xlu1 %v221_v22 }
  0x29   : > { %219 = vadd.xlane.f32.xlu0 %v218_v23 }
  0x30   : > { %234 = vadd.xlane.f32.xlu2 %v233_v27  ;;  %231 = vadd.xlane.f32.xlu1 %v230_v28 }
  0x31   : > { %228 = vadd.xlane.f32.xlu0 %v227_v29 }
  0x39   : > { %237 = vadd.xlane.f32.xlu0 %v236_v31 }
  0x83   : > { %v205_v39 = vpop.xlane.xlu2 %204  ;;  %v199_v40 = vpop.xlane.xlu1 %198 }
  0x84   : > { %v248_v41 = vmul.f32 %v854_v38, %v199_v40  ;;  %v193_v42 = vpop.xlane.xlu0 %192  ;;  %v250_v58 = vmul.f32 %v854_v38, %v205_v39 }
  0x85   : > { %v246_v43 = vmul.f32 %v854_v38, %v193_v42 }
  0x86   : > { %v858_v44 = vsub.f32 %v176_v1, %v248_v41 }
  0x87   : > { %v860_v45 = vsub.f32 %v174_v2, %v246_v43  ;;  %v890_v2 = vsub.f32 %v781_v0, %v250_v58 }
  0x88   : > { %v280_v46 = vmul.f32 %v858_v44, %v858_v44 }
  0x89   : > { %v278_v47 = vmul.f32 %v860_v45, %v860_v45  ;;  %v282_v11 = vmul.f32 %v890_v2, %v890_v2 }
  0x8a   : > { %v300_v48 = vsel %vm190_vm0, %v280_v46, 0.0 }
  0x8b   : > { %v208_v49 = vpop.xlane.xlu2 %207  ;;  %v202_v50 = vpop.xlane.xlu1 %201  ;;  %301 = vadd.xlane.f32.xlu0 %v300_v48  ;;  %v294_v51 = vsel %vm190_vm0, %v278_v47, 0.0 }
  0x8c   : > { %v251_v52 = vmul.f32 %v854_v38, %v208_v49  ;;  %v249_v53 = vmul.f32 %v854_v38, %v202_v50  ;;  %295 = vadd.xlane.f32.xlu1 %v294_v51  ;;  %v196_v54 = vpop.xlane.xlu0 %195 }
  0x8d   : > { %v247_v55 = vmul.f32 %v854_v38, %v196_v54 }
  0x8e   : > { %v872_v56 = vsub.f32 %v790_v6, %v251_v52  ;;  %v875_v57 = vsub.f32 %v793_v7, %v249_v53 }
  0x8f   : > { %v879_v59 = vsub.f32 %v796_v8, %v247_v55 }
  0x90   : > { %v283_v60 = vmul.f32 %v872_v56, %v872_v56  ;;  %v281_v61 = vmul.f32 %v875_v57, %v875_v57 }
  0x91   : > { %v279_v62 = vmul.f32 %v879_v59, %v879_v59 }
  0x92   : > { %v309_v63 = vsel %vm190_vm0, %v283_v60, 0.0  ;;  %v303_v1 = vsel %vm190_vm0, %v281_v61, 0.0 }
  0x93   : > { %v217_v3 = vpop.xlane.xlu2 %216  ;;  %310 = vadd.xlane.f32.xlu0 %v309_v63  ;;  %v297_v4 = vsel %vm190_vm0, %v279_v62, 0.0  ;;  %v214_v5 = vpop.xlane.xlu1 %213 }
  0x94   : > { %v254_v6 = vmul.f32 %v854_v38, %v217_v3  ;;  %304 = vadd.xlane.f32.xlu1 %v303_v1  ;;  %298 = vadd.xlane.f32.xlu2 %v297_v4  ;;  %v211_v7 = vpop.xlane.xlu0 %210  ;;  %v253_v9 = vmul.f32 %v854_v38, %v214_v5 }
  0x95   : > { %v252_v8 = vmul.f32 %v854_v38, %v211_v7 }
  0x96   : > { %v897_v10 = vsub.f32 %v805_v12, %v254_v6  ;;  %v907_v16 = vsub.f32 %v808_v13, %v253_v9  ;;  %v306_v12 = vsel %vm190_vm0, %v282_v11, 0.0 }
  0x97   : > { %v900_v0 = vsub.f32 %v811_v14, %v252_v8 }
  0x98   : > { %v286_v15 = vmul.f32 %v897_v10, %v897_v10  ;;  %v285_v31 = vmul.f32 %v907_v16, %v907_v16 }
  0x99   : > { %v284_v17 = vmul.f32 %v900_v0, %v900_v0 }
  0x9a   : > { %v318_v21 = vsel %vm190_vm0, %v286_v15, 0.0  ;;  %v315_v36 = vsel %vm190_vm0, %v285_v31, 0.0 }
  0x9b   : > { %v226_v22 = vpop.xlane.xlu2 %225  ;;  %319 = vadd.xlane.f32.xlu0 %v318_v21  ;;  %v312_v14 = vsel %vm190_vm0, %v284_v17, 0.0  ;;  %v223_v23 = vpop.xlane.xlu1 %222 }
  0x9c   : > { %v257_v27 = vmul.f32 %v854_v38, %v226_v22  ;;  %307 = vadd.xlane.f32.xlu2 %v306_v12  ;;  %313 = vadd.xlane.f32.xlu1 %v312_v14  ;;  %v220_v28 = vpop.xlane.xlu0 %219  ;;  %v256_v29 = vmul.f32 %v854_v38, %v223_v23 }
  0x9d   : > { %v255_v13 = vmul.f32 %v854_v38, %v220_v28 }
  0x9e   : > { %v920_v32 = vsub.f32 %v820_v18, %v257_v27  ;;  %v928_v35 = vsub.f32 %v823_v19, %v256_v29 }
  0x9f   : > { %v923_v33 = vsub.f32 %v826_v20, %v255_v13 }
  0xa0   : > { %v289_v34 = vmul.f32 %v920_v32, %v920_v32  ;;  %v288_v46 = vmul.f32 %v928_v35, %v928_v35 }
  0xa1   : > { %v287_v37 = vmul.f32 %v923_v33, %v923_v33 }
  0xa2   : > { %v327_v39 = vsel %vm190_vm0, %v289_v34, 0.0  ;;  %v324_v51 = vsel %vm190_vm0, %v288_v46, 0.0 }
  0xa3   : > { %v235_v40 = vpop.xlane.xlu2 %234  ;;  %328 = vadd.xlane.f32.xlu0 %v327_v39  ;;  %v321_v18 = vsel %vm190_vm0, %v287_v37, 0.0  ;;  %v232_v41 = vpop.xlane.xlu1 %231 }
  0xa4   : > { %v260_v20 = vmul.f32 %v854_v38, %v235_v40  ;;  %316 = vadd.xlane.f32.xlu2 %v315_v36  ;;  %322 = vadd.xlane.f32.xlu1 %v321_v18  ;;  %v229_v42 = vpop.xlane.xlu0 %228  ;;  %v259_v43 = vmul.f32 %v854_v38, %v232_v41 }
  0xa5   : > { %v258_v19 = vmul.f32 %v854_v38, %v229_v42 }
  0xa6   : > { %v941_v47 = vsub.f32 %v835_v24, %v260_v20  ;;  %v949_v50 = vsub.f32 %v838_v25, %v259_v43 }
  0xa7   : > { %v944_v48 = vsub.f32 %v841_v26, %v258_v19 }
  0xa8   : > { %v292_v49 = vmul.f32 %v941_v47, %v941_v47  ;;  %v291_v55 = vmul.f32 %v949_v50, %v949_v50 }
  0xa9   : > { %v290_v52 = vmul.f32 %v944_v48, %v944_v48 }
  0xaa   : > { %v336_v53 = vsel %vm190_vm0, %v292_v49, 0.0  ;;  %v333_v58 = vsel %vm190_vm0, %v291_v55, 0.0 }
  0xab   : > { %337 = vadd.xlane.f32.xlu0 %v336_v53  ;;  %v330_v24 = vsel %vm190_vm0, %v290_v52, 0.0 }
  0xac   : > { %325 = vadd.xlane.f32.xlu2 %v324_v51  ;;  %331 = vadd.xlane.f32.xlu1 %v330_v24  ;;  %v238_v26 = vpop.xlane.xlu0 %237  ;;  %v996_v51 = vld [vmem:[%s1234_s1] ss:$0 sm:$0xff] }
  0xad   : > { %v261_v54 = vmul.f32 %v854_v38, %v238_v26 }
  0xaf   : > { %v960_v25 = vsub.f32 %v850_v30, %v261_v54 }
  0xb1   : > { %v293_v60 = vmul.f32 %v960_v25, %v960_v25 }
  0xb3   : > { %v339_v61 = vsel %vm190_vm0, %v293_v60, 0.0  ;;  %v1013_v60 = vld [vmem:[%s1235_s2] ss:$0 sm:$0xff] }
  0xb4   : > { %334 = vadd.xlane.f32.xlu2 %v333_v58  ;;  %340 = vadd.xlane.f32.xlu1 %v339_v61 }
  0xfe   : > { %v302_v62 = vpop.xlane.xlu0 %301 }
  0xff   : > { %v296_v63 = vpop.xlane.xlu1 %295  ;;  %v344_v1 = vmul.f32 %v302_v62, %v854_v38 }
 0x100   : > { %v342_v3 = vmul.f32 %v296_v63, %v854_v38 }
 0x101   : > { %v360_v4 = vadd.f32 1e-05, %v344_v1 }
 0x102   : > { %v358_v5 = vadd.f32 1e-05, %v342_v3 }
 0x103   : > { %703 = vrsqrt.f32 %v360_v4  ;;  %vm400_vm4 = vweird.f32 %v360_v4 }
 0x104   : > { %705 = vrsqrt.f32 %v358_v5  ;;  %vm380_vm6 = vweird.f32 %v358_v5 }
 0x106   : > { %v311_v30 = vpop.xlane.xlu0 %310 }
 0x107   : > { %v305_v6 = vpop.xlane.xlu1 %304  ;;  %v299_v7 = vpop.xlane.xlu2 %298  ;;  %v347_v8 = vmul.f32 %v311_v30, %v854_v38 }
 0x108   : > { %v345_v9 = vmul.f32 %v305_v6, %v854_v38  ;;  %v343_v11 = vmul.f32 %v299_v7, %v854_v38 }
 0x109   : > { %v704_v15 = vpop.eup %703  ;;  %v971_v17 = vadd.f32 1e-05, %v347_v8 }
 0x10a   : > { %v706_v21 = vpop.eup %705  ;;  %v395_v22 = vmul.f32 %v704_v15, %v360_v4  ;;  %v973_v12 = vadd.f32 1e-05, %v345_v9  ;;  %v975_v14 = vadd.f32 1e-05, %v343_v11  ;;  %vm401_vm2 = vweird.f32 %v704_v15 }
 0x10b   : > { %v375_v23 = vmul.f32 %v706_v21, %v358_v5  ;;  %707 = vrsqrt.f32 %v971_v17  ;;  %vm381_vm3 = vweird.f32 %v706_v21  ;;  %vm402_vm7 = vmor %vm400_vm4, %vm401_vm2  ;;  %vm430_vm8 = vweird.f32 %v971_v17 }
 0x10c   : > { %v396_v27 = vmul.f32 %v704_v15, %v395_v22  ;;  %709 = vrsqrt.f32 %v973_v12  ;;  %vm382_vm9 = vmor %vm380_vm6, %vm381_vm3  ;;  %vm410_vm10 = vweird.f32 %v973_v12  ;;  %vm390_vm14 = vweird.f32 %v975_v14 }
 0x10d   : > { %v376_v28 = vmul.f32 %v706_v21, %v375_v23  ;;  %711 = vrsqrt.f32 %v975_v14 }
 0x10e   : > { %v397_v13 = vmul.f32 0.5, %v396_v27  ;;  %v320_v29 = vpop.xlane.xlu0 %319 }
 0x10f   : > { %v377_v31 = vmul.f32 0.5, %v376_v28  ;;  %v308_v34 = vpop.xlane.xlu2 %307  ;;  %v314_v36 = vpop.xlane.xlu1 %313  ;;  %v350_v18 = vmul.f32 %v320_v29, %v854_v38 }
 0x110   : > { %v398_v37 = vsub.f32 1.5, %v397_v13  ;;  %v346_v39 = vmul.f32 %v308_v34, %v854_v38  ;;  %v348_v40 = vmul.f32 %v314_v36, %v854_v38 }
 0x111   : > { %v983_v41 = vpop.eup %707  ;;  %v378_v20 = vsub.f32 1.5, %v377_v31  ;;  %v1008_v58 = vadd.f32 1e-05, %v350_v18 }
 0x112   : > { %v985_v42 = vpop.eup %709  ;;  %v399_v19 = vmul.f32 %v704_v15, %v398_v37  ;;  %v425_v43 = vmul.f32 %v983_v41, %v971_v17  ;;  %v989_v46 = vadd.f32 1e-05, %v346_v39  ;;  %v1002_v24 = vadd.f32 1e-05, %v348_v40 }
 0x113   : > { %v991_v49 = vpop.eup %711  ;;  %v379_v52 = vmul.f32 %v706_v21, %v378_v20  ;;  %v405_v53 = vmul.f32 %v985_v42, %v973_v12  ;;  %vm431_vm11 = vweird.f32 %v983_v41  ;;  %vm411_vm12 = vweird.f32 %v985_v42 }
 0x114   : > { %v403_v26 = vsel %vm402_vm7, %v704_v15, %v399_v19  ;;  %v385_v54 = vmul.f32 %v991_v49, %v975_v14  ;;  %v426_v55 = vmul.f32 %v983_v41, %v425_v43  ;;  %713 = vrsqrt.f32 %v989_v46  ;;  %vm432_vm15 = vmor %vm430_vm8, %vm431_vm11 }
 0x115   : > { %v383_v61 = vsel %vm382_vm9, %v706_v21, %v379_v52  ;;  %v536_v62 = vmul.f32 %v403_v26, %v858_v44  ;;  %v406_v63 = vmul.f32 %v985_v42, %v405_v53  ;;  %715 = vrsqrt.f32 %v1002_v24  ;;  %vm1052_vm0 = vmor %vm410_vm10, %vm411_vm12 }
 0x116   : > { %v534_v1 = vmul.f32 %v383_v61, %v860_v45  ;;  %v386_v3 = vmul.f32 %v991_v49, %v385_v54  ;;  %v427_v4 = vmul.f32 0.5, %v426_v55  ;;  %717 = vrsqrt.f32 %v1008_v58  ;;  %v329_v37 = vpop.xlane.xlu0 %328 }
 0x117   : > { %v556_v5 = vmul.f32 %v996_v51, %v536_v62  ;;  %v407_v30 = vmul.f32 0.5, %v406_v63  ;;  %v317_v44 = vpop.xlane.xlu2 %316  ;;  %vm391_vm13 = vweird.f32 %v991_v49  ;;  %v323_v23 = vpop.xlane.xlu1 %322  ;;  %vm420_vm1 = vweird.f32 %v989_v46 }
 0x118   : > { %v554_v6 = vmul.f32 %v996_v51, %v534_v1  ;;  %v387_v7 = vmul.f32 0.5, %v386_v3  ;;  %v428_v8 = vsub.f32 1.5, %v427_v4  ;;  %v349_v11 = vmul.f32 %v317_v44, %v854_v38  ;;  %vm392_vm2 = vmor %vm390_vm14, %vm391_vm13 }
 0x119   : > { %v576_v45 = vadd.f32 %v1013_v60, %v556_v5  ;;  %v408_v9 = vsub.f32 1.5, %v407_v30  ;;  %vm460_vm3 = vweird.f32 %v1008_v58  ;;  %v351_v18 = vmul.f32 %v323_v23, %v854_v38 }
 0x11a   : > { %v574_v15 = vadd.f32 %v1013_v60, %v554_v6  ;;  %v388_v21 = vsub.f32 1.5, %v387_v7  ;;  %v429_v22 = vmul.f32 %v983_v41, %v428_v8  ;;  %v1038_v27 = vpop.eup %713  ;;  %v1046_v29 = vadd.f32 1e-05, %v349_v11 }
 0x11b   : > { %v592_v28 = vpack.c.bf16 %v576_v45, %v576_v45  ;;  %v409_v13 = vmul.f32 %v985_v42, %v408_v9  ;;  %v415_v17 = vmul.f32 %v1038_v27, %v989_v46  ;;  %v1061_v39 = vpop.eup %715  ;;  %v353_v26 = vmul.f32 %v329_v37, %v854_v38 }
 0x11c   : > { %v590_v31 = vpack.c.bf16 %v574_v15, %v574_v15  ;;  %v389_v36 = vmul.f32 %v991_v49, %v388_v21  ;;  %v433_v14 = vsel %vm432_vm15, %v983_v41, %v429_v22  ;;  %719 = vrsqrt.f32 %v1046_v29  ;;  %v718_v41 = vpop.eup %717 }
 0x11d   : > { %609 = vst.msk [vmem:[%s1033_s26 + $0x8] sm:$0xf] %vm606_vm5, %v592_v28  ;;  %v413_v12 = vsel %vm1052_vm0, %v985_v42, %v409_v13  ;;  %v539_v40 = vmul.f32 %v433_v14, %v872_v56  ;;  %v416_v42 = vmul.f32 %v1038_v27, %v415_v17  ;;  %v435_v43 = vmul.f32 %v1061_v39, %v1002_v24 }
 0x11e   : > { %607 = vst.msk [vmem:[%s1033_s26] sm:$0xf] %vm606_vm5, %v590_v31  ;;  %v537_v20 = vmul.f32 %v413_v12, %v875_v57  ;;  %v393_v19 = vsel %vm392_vm2, %v991_v49, %v389_v36  ;;  %v455_v53 = vmul.f32 %v718_v41, %v1008_v58  ;;  %vm421_vm4 = vweird.f32 %v1038_v27  ;;  %v338_v31 = vpop.xlane.xlu0 %337 }
 0x11f   : > { %v535_v56 = vmul.f32 %v393_v19, %v879_v59  ;;  %v559_v52 = vmul.f32 %v996_v51, %v539_v40  ;;  %v417_v55 = vmul.f32 0.5, %v416_v42  ;;  %v436_v57 = vmul.f32 %v1061_v39, %v435_v43  ;;  %v326_v49 = vpop.xlane.xlu2 %325  ;;  %vm422_vm7 = vmor %vm420_vm1, %vm421_vm4  ;;  %v332_v22 = vpop.xlane.xlu1 %331 }
 0x120   : > { %v557_v54 = vmul.f32 %v996_v51, %v537_v20  ;;  %vm441_vm6 = vweird.f32 %v1061_v39  ;;  %v456_v59 = vmul.f32 %v718_v41, %v455_v53  ;;  %v1092_v4 = vadd.f32 1e-05, %v351_v18 }
 0x121   : > { %v555_v61 = vmul.f32 %v996_v51, %v535_v56  ;;  %v579_v62 = vadd.f32 %v1013_v60, %v559_v52  ;;  %v418_v1 = vsub.f32 1.5, %v417_v55  ;;  %v437_v3 = vmul.f32 0.5, %v436_v57 }
 0x122   : > { %v577_v63 = vadd.f32 %v1013_v60, %v557_v54  ;;  %v1094_v5 = vpop.eup %719  ;;  %v457_v6 = vmul.f32 0.5, %v456_v59  ;;  %v1097_v7 = vadd.f32 1e-05, %v353_v26  ;;  %vm461_vm8 = vweird.f32 %v718_v41 }
 0x123   : > { %v575_v30 = vadd.f32 %v1013_v60, %v555_v61  ;;  %v595_v44 = vpack.c.bf16 %v579_v62, %v579_v62  ;;  %v419_v45 = vmul.f32 %v1038_v27, %v418_v1  ;;  %v438_v9 = vsub.f32 1.5, %v437_v3  ;;  %vm462_vm11 = vmor %vm460_vm3, %vm461_vm8 }
 0x124   : > { %v593_v8 = vpack.c.bf16 %v577_v63, %v577_v63  ;;  %v445_v11 = vmul.f32 %v1094_v5, %v1046_v29  ;;  %v458_v21 = vsub.f32 1.5, %v457_v6  ;;  %721 = vrsqrt.f32 %v1092_v4 }
 0x125   : > { %v591_v15 = vpack.c.bf16 %v575_v30, %v575_v30  ;;  %612 = vst.msk [vmem:[%s1033_s26 + $0x14] sm:$0xf] %vm606_vm5, %v595_v44  ;;  %v423_v23 = vsel %vm422_vm7, %v1038_v27, %v419_v45  ;;  %v439_v28 = vmul.f32 %v1061_v39, %v438_v9  ;;  %vm440_vm9 = vweird.f32 %v1002_v24 }
 0x126   : > { %610 = vst.msk [vmem:[%s1033_s26 + $0xc] sm:$0xf] %vm606_vm5, %v593_v8  ;;  %v446_v13 = vmul.f32 %v1094_v5, %v445_v11  ;;  %v538_v46 = vmul.f32 %v423_v23, %v890_v2  ;;  %vm442_vm10 = vmor %vm440_vm9, %vm441_vm6  ;;  %v459_v34 = vmul.f32 %v718_v41, %v458_v21  ;;  %723 = vrsqrt.f32 %v1097_v7 }
 0x127   : > { %608 = vst.msk [vmem:[%s1033_s26 + $0x4] sm:$0xf] %vm606_vm5, %v591_v15  ;;  %v443_v36 = vsel %vm442_vm10, %v1061_v39, %v439_v28  ;;  %v352_v27 = vmul.f32 %v326_v49, %v854_v38  ;;  %v354_v14 = vmul.f32 %v332_v22, %v854_v38  ;;  %v356_v12 = vmul.f32 %v338_v31, %v854_v38  ;;  %v335_v58 = vpop.xlane.xlu2 %334  ;;  %v341_v59 = vpop.xlane.xlu1 %340 }
 0x128   : > { %v447_v24 = vmul.f32 0.5, %v446_v13  ;;  %v558_v17 = vmul.f32 %v996_v51, %v538_v46  ;;  %v540_v2 = vmul.f32 %v443_v36, %v900_v0  ;;  %v463_v37 = vsel %vm462_vm11, %v718_v41, %v459_v34 }
 0x129   : > { %v542_v40 = vmul.f32 %v463_v37, %v897_v10  ;;  %vm451_vm12 = vweird.f32 %v1094_v5  ;;  %v1132_v39 = vadd.f32 1e-05, %v352_v27  ;;  %vm450_vm13 = vweird.f32 %v1046_v29 }
 0x12a   : > { %v448_v18 = vsub.f32 1.5, %v447_v24  ;;  %v722_v20 = vpop.eup %721  ;;  %v578_v19 = vadd.f32 %v1013_v60, %v558_v17  ;;  %v560_v42 = vmul.f32 %v996_v51, %v540_v2  ;;  %v1137_v0 = vadd.f32 1e-05, %v354_v14  ;;  %vm452_vm14 = vmor %vm450_vm13, %vm451_vm12 }
 0x12b   : > { %v562_v41 = vmul.f32 %v996_v51, %v542_v40  ;;  %v465_v43 = vmul.f32 %v722_v20, %v1092_v4  ;;  %v1142_v56 = vadd.f32 1e-05, %v356_v12  ;;  %725 = vrsqrt.f32 %v1132_v39 }
 0x12c   : > { %v449_v10 = vmul.f32 %v1094_v5, %v448_v18  ;;  %v724_v52 = vpop.eup %723  ;;  %v594_v53 = vpack.c.bf16 %v578_v19, %v578_v19  ;;  %v580_v26 = vadd.f32 %v1013_v60, %v560_v42  ;;  %v355_v29 = vmul.f32 %v335_v58, %v854_v38 }
 0x12d   : > { %v582_v54 = vadd.f32 %v1013_v60, %v562_v41  ;;  %v466_v57 = vmul.f32 %v722_v20, %v465_v43  ;;  %v485_v49 = vmul.f32 %v724_v52, %v1097_v7  ;;  %727 = vrsqrt.f32 %v1137_v0 }
 0x12e   : > { %v453_v55 = vsel %vm452_vm14, %v1094_v5, %v449_v10  ;;  %611 = vst.msk [vmem:[%s1033_s26 + $0x10] sm:$0xf] %vm606_vm5, %v594_v53  ;;  %v596_v61 = vpack.c.bf16 %v580_v26, %v580_v26  ;;  %729 = vrsqrt.f32 %v1142_v56  ;;  %v1160_v5 = vadd.f32 1e-05, %v355_v29 }
 0x12f   : > { %v541_v62 = vmul.f32 %v453_v55, %v907_v16  ;;  %v598_v63 = vpack.c.bf16 %v582_v54, %v582_v54  ;;  %v467_v1 = vmul.f32 0.5, %v466_v57  ;;  %v486_v3 = vmul.f32 %v724_v52, %v485_v49 }
 0x130   : > { %613 = vst.msk [vmem:[%s1033_s26 + $0x18] sm:$0xf] %vm606_vm5, %v596_v61  ;;  %vm471_vm15 = vweird.f32 %v722_v20  ;;  %v357_v16 = vmul.f32 %v341_v59, %v854_v38  ;;  %vm470_vm0 = vweird.f32 %v1092_v4  ;;  %vm490_vm1 = vweird.f32 %v1097_v7 }
 0x131   : > { %v561_v30 = vmul.f32 %v996_v51, %v541_v62  ;;  %615 = vst.msk [vmem:[%s1033_s26 + $0x20] sm:$0xf] %vm606_vm5, %v598_v63  ;;  %v468_v44 = vsub.f32 1.5, %v467_v1  ;;  %v487_v6 = vmul.f32 0.5, %v486_v3  ;;  %v726_v8 = vpop.eup %725  ;;  %731 = vrsqrt.f32 %v1160_v5  ;;  %vm472_vm3 = vmor %vm470_vm0, %vm471_vm15 }
 0x132   : > { %vm491_vm2 = vweird.f32 %v724_v52  ;;  %v475_v15 = vmul.f32 %v726_v8, %v1132_v39  ;;  %v1170_v23 = vadd.f32 1e-05, %v357_v16  ;;  %vm480_vm6 = vweird.f32 %v1132_v39 }
 0x133   : > { %v581_v45 = vadd.f32 %v1013_v60, %v561_v30  ;;  %v469_v9 = vmul.f32 %v722_v20, %v468_v44  ;;  %v488_v11 = vsub.f32 1.5, %v487_v6  ;;  %v728_v21 = vpop.eup %727  ;;  %vm492_vm4 = vmor %vm490_vm1, %vm491_vm2  ;;  %vm481_vm7 = vweird.f32 %v726_v8 }
 0x134   : > { %v476_v13 = vmul.f32 %v726_v8, %v475_v15  ;;  %v495_v4 = vmul.f32 %v728_v21, %v1137_v0  ;;  %v730_v31 = vpop.eup %729  ;;  %733 = vrsqrt.f32 %v1170_v23  ;;  %vm500_vm8 = vweird.f32 %v1137_v0  ;;  %vm482_vm10 = vmor %vm480_vm6, %vm481_vm7 }
 0x135   : > { %v597_v22 = vpack.c.bf16 %v581_v45, %v581_v45  ;;  %v473_v38 = vsel %vm472_vm3, %v722_v20, %v469_v9  ;;  %v489_v28 = vmul.f32 %v724_v52, %v488_v11  ;;  %v515_v27 = vmul.f32 %v730_v31, %v1142_v56 }
 0x136   : > { %v543_v46 = vmul.f32 %v473_v38, %v923_v33  ;;  %v477_v36 = vmul.f32 0.5, %v476_v13  ;;  %v496_v24 = vmul.f32 %v728_v21, %v495_v4  ;;  %vm501_vm9 = vweird.f32 %v728_v21 }
 0x137   : > { %614 = vst.msk [vmem:[%s1033_s26 + $0x1c] sm:$0xf] %vm606_vm5, %v597_v22  ;;  %v493_v34 = vsel %vm492_vm4, %v724_v52, %v489_v28  ;;  %v732_v14 = vpop.eup %731  ;;  %v516_v12 = vmul.f32 %v730_v31, %v515_v27  ;;  %vm520_vm11 = vweird.f32 %v1142_v56  ;;  %vm521_vm12 = vweird.f32 %v730_v31  ;;  %vm502_vm13 = vmor %vm500_vm8, %vm501_vm9 }
 0x138   : > { %v563_v17 = vmul.f32 %v996_v51, %v543_v46  ;;  %v545_v2 = vmul.f32 %v493_v34, %v920_v32  ;;  %v478_v37 = vsub.f32 1.5, %v477_v36  ;;  %v497_v33 = vmul.f32 0.5, %v496_v24  ;;  %vm522_vm15 = vmor %vm520_vm11, %vm521_vm12 }
 0x139   : > { %v505_v7 = vmul.f32 %v732_v14, %v1160_v5  ;;  %v517_v19 = vmul.f32 0.5, %v516_v12  ;;  %vm511_vm14 = vweird.f32 %v732_v14  ;;  %vm510_vm0 = vweird.f32 %v1160_v5 }
 0x13a   : > { %v583_v40 = vadd.f32 %v1013_v60, %v563_v17  ;;  %v565_v18 = vmul.f32 %v996_v51, %v545_v2  ;;  %v479_v58 = vmul.f32 %v726_v8, %v478_v37  ;;  %v498_v20 = vsub.f32 1.5, %v497_v33  ;;  %v734_v42 = vpop.eup %733  ;;  %vm512_vm1 = vmor %vm510_vm0, %vm511_vm14 }
 0x13b   : > { %v506_v32 = vmul.f32 %v732_v14, %v505_v7  ;;  %v518_v53 = vsub.f32 1.5, %v517_v19  ;;  %v525_v39 = vmul.f32 %v734_v42, %v1170_v23  ;;  %vm531_vm2 = vweird.f32 %v734_v42 }
 0x13c   : > { %v599_v41 = vpack.c.bf16 %v583_v40, %v583_v40  ;;  %v585_v10 = vadd.f32 %v1013_v60, %v565_v18  ;;  %v483_v43 = vsel %vm482_vm10, %v726_v8, %v479_v58  ;;  %v499_v52 = vmul.f32 %v728_v21, %v498_v20 }
 0x13d   : > { %v507_v26 = vmul.f32 0.5, %v506_v32  ;;  %v544_v54 = vmul.f32 %v483_v43, %v928_v35  ;;  %v519_v57 = vmul.f32 %v730_v31, %v518_v53  ;;  %v526_v35 = vmul.f32 %v734_v42, %v525_v39 }
 0x13e   : > { %616 = vst.msk [vmem:[%s1033_s26 + $0x24] sm:$0xf] %vm606_vm5, %v599_v41  ;;  %v601_v29 = vpack.c.bf16 %v585_v10, %v585_v10  ;;  %v503_v55 = vsel %vm502_vm13, %v728_v21, %v499_v52  ;;  %vm530_vm3 = vweird.f32 %v1170_v23 }
 0x13f   : > { %v508_v49 = vsub.f32 1.5, %v507_v26  ;;  %v564_v61 = vmul.f32 %v996_v51, %v544_v54  ;;  %v546_v62 = vmul.f32 %v503_v55, %v944_v48  ;;  %v523_v0 = vsel %vm522_vm15, %v730_v31, %v519_v57  ;;  %vm532_vm4 = vmor %vm530_vm3, %vm531_vm2 }
 0x140   : > { %618 = vst.msk [vmem:[%s1033_s26 + $0x2c] sm:$0xf] %vm606_vm5, %v601_v29  ;;  %v548_v3 = vmul.f32 %v523_v0, %v941_v47  ;;  %v527_v30 = vmul.f32 0.5, %v526_v35 }
 0x141   : > { %v509_v59 = vmul.f32 %v732_v14, %v508_v49  ;;  %v584_v63 = vadd.f32 %v1013_v60, %v564_v61  ;;  %v566_v1 = vmul.f32 %v996_v51, %v546_v62 }
 0x142   : > { %v568_v6 = vmul.f32 %v996_v51, %v548_v3  ;;  %v528_v8 = vsub.f32 1.5, %v527_v30 }
 0x143   : > { %v513_v48 = vsel %vm512_vm1, %v732_v14, %v509_v59  ;;  %v600_v44 = vpack.c.bf16 %v584_v63, %v584_v63  ;;  %v586_v56 = vadd.f32 %v1013_v60, %v566_v1 }
 0x144   : > { %v547_v16 = vmul.f32 %v513_v48, %v949_v50  ;;  %v588_v47 = vadd.f32 %v1013_v60, %v568_v6  ;;  %v529_v9 = vmul.f32 %v734_v42, %v528_v8 }
 0x145   : > { %617 = vst.msk [vmem:[%s1033_s26 + $0x28] sm:$0xf] %vm606_vm5, %v600_v44  ;;  %v602_v5 = vpack.c.bf16 %v586_v56, %v586_v56 }
 0x146   : > { %v567_v45 = vmul.f32 %v996_v51, %v547_v16  ;;  %v604_v11 = vpack.c.bf16 %v588_v47, %v588_v47  ;;  %v533_v50 = vsel %vm532_vm4, %v734_v42, %v529_v9 }
 0x147   : > { %619 = vst.msk [vmem:[%s1033_s26 + $0x30] sm:$0xf] %vm606_vm5, %v602_v5  ;;  %v549_v22 = vmul.f32 %v533_v50, %v960_v25 }
 0x148   : > { %v587_v15 = vadd.f32 %v1013_v60, %v567_v45  ;;  %621 = vst.msk [vmem:[%s1033_s26 + $0x38] sm:$0xf] %vm606_vm5, %v604_v11 }
 0x149   : > { %v569_v38 = vmul.f32 %v996_v51, %v549_v22 }
 0x14a   : > { %v603_v21 = vpack.c.bf16 %v587_v15, %v587_v15 }
 0x14b   : > { %v589_v28 = vadd.f32 %v1013_v60, %v569_v38 }
 0x14c   : > { %620 = vst.msk [vmem:[%s1033_s26 + $0x34] sm:$0xf] %vm606_vm5, %v603_v21 }
 0x14d   : > { %v605_v13 = vpack.c.bf16 %v589_v28, %v589_v28 }
 0x14f   : > { %622 = vst.msk [vmem:[%s1033_s26 + $0x3c] sm:$0xf] %vm606_vm5, %v605_v13 }
 0x150 PF: > { %s13_s12 = sadd.s32 1, %s741_s12  }
 0x151   : > { %p10_p4 = scmp.ge.s32.totalorder %s13_s12, 4  }
 0x153   :  { %12 = sbr.rel (!%p10_p4) target bundleno = 1 (0x1), region = 62 }

</bundles_post_ra>
